<compile_context>
chip_gen: v7x
topology: tpu7x:2x2x1
jax: 0.10.0
libtpu: 0.0.40
codegen_flags: <defaults>
</compile_context>

<pallas_src>
import functools

import jax
import jax.numpy as jnp
from jax import lax
from jax.experimental import pallas as pl
from jax.experimental.pallas import tpu as pltpu


def _round_up(x, m):
    return ((x + m - 1) // m) * m


def _aggregate_mlp_kernel(idx_row_ref, idx_col_ref, y_ref,
                          w1_ref, b1_ref, w2_ref, g_ref, beta_ref,
                          zvar_ref, z_acc, *maybe_cnt,
                          aggr, nv_pad, hidden, eps):
    k = pl.program_id(0)
    cnt = maybe_cnt[0] if maybe_cnt else None

    @pl.when(k == 0)
    def _init():
        if aggr == "max":
            z_acc[...] = jnp.full(z_acc.shape, -jnp.inf, dtype=z_acc.dtype)
        else:
            z_acc[...] = jnp.zeros_like(z_acc)
        if cnt is not None:
            cnt[...] = jnp.zeros_like(cnt)

    # One-hot built *transposed* (num_var, tile): iota over sublanes vs idx along lanes.
    # The scatter below then contracts the lane axis -> plain matmul, no XLU transpose.
    idx_row = idx_row_ref[...]                                     # (1, tile) int32
    tile = idx_row.shape[1]
    row_iota = lax.broadcasted_iota(jnp.int32, (nv_pad, tile), 0)
    mask_t = row_iota == idx_row                                   # (nv_pad, tile) bool

    if cnt is not None:                    # per-segment counts (mean / empty-max handling)
        cnt[...] += jnp.sum(mask_t.astype(jnp.float32), axis=1, keepdims=True)

    if aggr in ("sum", "mean"):
        # exact segment-sum as an f32 MXU matmul (phase is HBM-bound on streaming y).
        z_acc[...] += jnp.dot(mask_t.astype(jnp.float32), y_ref[...],
                              preferred_element_type=jnp.float32)
    else:  # max: blocked masked segment-max, 8 segments per iteration -> full (8,H) stores
        idx_col = idx_col_ref[...]                                 # (tile, 1) int32
        y = y_ref[...]                                             # f32
        n_blk = nv_pad // 8

        def blk_body(blk, carry):
            rows = []
            for jj in range(8):                                    # static inner unroll
                m = idx_col == (blk * 8 + jj)                      # (tile, 1)
                rows.append(jnp.max(jnp.where(m, y, -jnp.inf), axis=0, keepdims=True))
            blk_max = jnp.concatenate(rows, axis=0)                # (8, H_pad)
            base = pl.multiple_of(blk * 8, 8)
            z_acc[pl.ds(base, 8), :] = jnp.maximum(z_acc[pl.ds(base, 8), :], blk_max)
            return carry

        lax.fori_loop(0, n_blk, blk_body, 0, unroll=n_blk <= 8)

    @pl.when(k == pl.num_programs(0) - 1)
    def _finalize():
        z = z_acc[...]
        if aggr == "mean":
            z = z / jnp.maximum(cnt[...], 1.0)
        elif aggr == "max":
            z = jnp.where(cnt[...] > 0.0, z, 0.0)  # empty segments -> 0 (drops -inf)
        # var_enc: Linear(bias) -> ReLU -> Linear(no bias) -> LayerNorm
        h = jnp.dot(z, w1_ref[...], preferred_element_type=jnp.float32) + b1_ref[...]
        h = jnp.maximum(h, 0.0)
        h = jnp.dot(h, w2_ref[...], preferred_element_type=jnp.float32)
        # LayerNorm over the TRUE hidden size; lanes >= hidden are zero-padded and masked.
        inv_h = 1.0 / hidden
        mu = jnp.sum(h, axis=-1, keepdims=True) * inv_h
        lane = lax.broadcasted_iota(jnp.int32, h.shape, 1)
        diff = jnp.where(lane < hidden, h - mu, 0.0)
        var = jnp.sum(diff * diff, axis=-1, keepdims=True) * inv_h
        zvar_ref[...] = (diff * lax.rsqrt(var + eps) * g_ref[...]
                         + beta_ref[...]).astype(zvar_ref.dtype)


def _gather_residual_kernel(idx_col_ref, y_ref, zvar_ref, out_ref, *, nv_pad):
    idx = idx_col_ref[...]                                         # (tile, 1) int32
    tile = idx.shape[0]
    col_iota = lax.broadcasted_iota(jnp.int32, (tile, nv_pad), 1)
    one_hot = (col_iota == idx).astype(jnp.float32)
    # z_var[var_idx] as a small exact one-hot MXU matmul (fine while num_var is small).
    # TODO(synk): switch to per-row dynamic VMEM gathers if num_var grows to O(1k+).
    gathered = jnp.dot(one_hot, zvar_ref[...], preferred_element_type=jnp.float32)
    out_ref[...] = (y_ref[...] + gathered).astype(out_ref.dtype)


def val2val_layer(y_val, var_idx, num_var, params, aggr):
    assert aggr in ("sum", "mean", "max")
    num_val, hidden = y_val.shape
    f32 = jnp.float32

    h_pad = _round_up(hidden, 128)                       # lane-dense hidden dim
    nv_pad = max(_round_up(num_var, 8), 8)               # sublane-aligned num_var
    tile = 1024 if num_val >= 1024 else _round_up(max(num_val, 1), 128)
    nval_pad = _round_up(num_val, tile)
    n_tiles = nval_pad // tile

    # ---- padding (zeros in padded lanes keep MLP + masked LayerNorm exact) -------------
    if (nval_pad, h_pad) == (num_val, hidden):
        y_pad = y_val.astype(f32)
    else:
        y_pad = jnp.zeros((nval_pad, h_pad), f32).at[:num_val, :hidden].set(
            y_val.astype(f32))
    # padded rows get sentinel == num_var so they never touch a real segment row
    idx_pad = jnp.full((nval_pad,), num_var, jnp.int32).at[:num_val].set(
        var_idx.astype(jnp.int32))
    idx_row = idx_pad.reshape(1, nval_pad)
    idx_col = idx_pad.reshape(nval_pad, 1)

    def pad2(w):
        if w.shape == (h_pad, h_pad):
            return w.astype(f32)
        return jnp.zeros((h_pad, h_pad), f32).at[:w.shape[0], :w.shape[1]].set(
            w.astype(f32))

    def pad1(v):
        if v.shape[0] == h_pad:
            return v.astype(f32).reshape(1, h_pad)
        return jnp.zeros((1, h_pad), f32).at[0, :v.shape[0]].set(v.astype(f32))

    w1t = pad2(params["w1"].T)                           # kernel computes z @ W1^T
    w2t = pad2(params["w2"].T)
    b1 = pad1(params["b1"])
    gamma = pad1(params["ln_gamma"])
    beta = pad1(params["ln_beta"])

    full2 = lambda shape: pl.BlockSpec(shape, lambda k: (0, 0))

    # ------------- phase 1: aggregate + var_enc -> z_var (nv_pad, h_pad) ----------------
    agg_kernel = functools.partial(_aggregate_mlp_kernel, aggr=aggr, nv_pad=nv_pad,
                                   hidden=hidden, eps=1e-5)
    scratch = [pltpu.VMEM((nv_pad, h_pad), f32)]
    if aggr != "sum":                                    # counts only for mean / max
        scratch.append(pltpu.VMEM((nv_pad, 1), f32))

    z_var = pl.pallas_call(
        agg_kernel,
        out_shape=jax.ShapeDtypeStruct((nv_pad, h_pad), f32),
        grid_spec=pltpu.PrefetchScalarGridSpec(
            num_scalar_prefetch=0,
            grid=(n_tiles,),
            in_specs=[
                pl.BlockSpec((1, tile), lambda k: (0, k)),        # idx along lanes
                pl.BlockSpec((tile, 1), lambda k: (k, 0)),        # idx along sublanes
                pl.BlockSpec((tile, h_pad), lambda k: (k, 0)),    # y tile (f32)
                full2((h_pad, h_pad)),                            # w1^T (resident)
                full2((1, h_pad)),                                # b1
                full2((h_pad, h_pad)),                            # w2^T (resident)
                full2((1, h_pad)),                                # gamma
                full2((1, h_pad)),                                # beta
            ],
            out_specs=pl.BlockSpec((nv_pad, h_pad), lambda k: (0, 0)),
            scratch_shapes=scratch,
        ),
        compiler_params=pltpu.CompilerParams(dimension_semantics=("arbitrary",)),
        cost_estimate=pl.CostEstimate(
            flops=int(2 * nval_pad * nv_pad * h_pad + 4 * nv_pad * h_pad * h_pad),
            transcendentals=int(nv_pad),
            bytes_accessed=int(nval_pad * h_pad * 4 + 2 * h_pad * h_pad * 4
                               + nv_pad * h_pad * 4 + nval_pad * 8),
        ),
    )(idx_row, idx_col, y_pad, w1t, b1, w2t, gamma, beta)

    # ------------- phase 2: y += z_var[var_idx]  (parallel over num_val tiles) ----------
    gather_kernel = functools.partial(_gather_residual_kernel, nv_pad=nv_pad)
    out_pad = pl.pallas_call(
        gather_kernel,
        out_shape=jax.ShapeDtypeStruct((nval_pad, h_pad), y_val.dtype),
        grid_spec=pltpu.PrefetchScalarGridSpec(
            num_scalar_prefetch=0,
            grid=(n_tiles,),
            in_specs=[
                pl.BlockSpec((tile, 1), lambda k: (k, 0)),        # idx
                pl.BlockSpec((tile, h_pad), lambda k: (k, 0)),    # y tile (f32 residual)
                pl.BlockSpec((nv_pad, h_pad), lambda k: (0, 0)),  # z_var (resident)
            ],
            out_specs=pl.BlockSpec((tile, h_pad), lambda k: (k, 0)),
        ),
        compiler_params=pltpu.CompilerParams(dimension_semantics=("parallel",)),
        cost_estimate=pl.CostEstimate(
            flops=int(2 * nval_pad * nv_pad * h_pad + nval_pad * h_pad),
            transcendentals=0,
            bytes_accessed=int(2 * nval_pad * h_pad * 4 + nv_pad * h_pad * 4 + nval_pad * 4),
        ),
    )(idx_col, y_pad, z_var)

    if (nval_pad, h_pad) == (num_val, hidden):
        return out_pad.astype(y_val.dtype)
    return out_pad[:num_val, :hidden].astype(y_val.dtype)


def _reference(y_val, var_idx, num_var, params, aggr):
    # pure-JAX (f32) reference of the PyTorch forward
    if aggr == "sum":
        z = jax.ops.segment_sum(y_val, var_idx, num_segments=num_var)
    elif aggr == "mean":
        s = jax.ops.segment_sum(y_val, var_idx, num_segments=num_var)
        c = jax.ops.segment_sum(jnp.ones((y_val.shape[0], 1)), var_idx,
                                num_segments=num_var)
        z = s / jnp.maximum(c, 1.0)
    else:
        m = jax.ops.segment_max(y_val, var_idx, num_segments=num_var)
        c = jax.ops.segment_sum(jnp.ones((y_val.shape[0],)), var_idx,
                                num_segments=num_var)
        z = jnp.where((c > 0)[:, None], m, 0.0)
    h = jnp.maximum(z @ params["w1"].T + params["b1"], 0.0)
    h = h @ params["w2"].T
    mu = h.mean(-1, keepdims=True)
    var = ((h - mu) ** 2).mean(-1, keepdims=True)
    z_var = (h - mu) / jnp.sqrt(var + 1e-5) * params["ln_gamma"] + params["ln_beta"]
    return y_val + z_var[var_idx]


if __name__ == "__main__":
    config = {"hidden_dim": 32, "aggr_val2var": "mean"}
    hidden = config["hidden_dim"]
    num_val, num_var = 16, 8

    key = jax.random.PRNGKey(0)
    k1, k2, k3, k4, k5, k6 = jax.random.split(key, 6)
    y_val = jax.random.normal(k1, (num_val, hidden), dtype=jnp.float32)
    var_idx = jax.random.randint(k2, (num_val,), 0, num_var, dtype=jnp.int32)

    # deterministic synthetic parameters (PyTorch Linear weights are (out, in))
    params = {
        "w1": jax.random.normal(k3, (hidden, hidden), jnp.float32) * 0.1,
        "b1": jax.random.normal(k4, (hidden,), jnp.float32) * 0.1,
        "w2": jax.random.normal(k5, (hidden, hidden), jnp.float32) * 0.1,
        "ln_gamma": 1.0 + 0.05 * jax.random.normal(k6, (hidden,), jnp.float32),
        "ln_beta": jnp.zeros((hidden,), jnp.float32),
    }

    for aggr in (config["aggr_val2var"], "sum", "max"):
        out = jax.block_until_ready(val2val_layer(y_val, var_idx, num_var, params, aggr))
        ref = _reference(y_val, var_idx, num_var, params, aggr)
        assert out.shape == (num_val, hidden)
        assert jnp.allclose(out, ref, rtol=2e-3, atol=2e-3), f"mismatch for aggr={aggr}"

    print("KERNEL_OK")
</pallas_src>

<mosaic_0001>
module attributes {stable_mosaic.version = 11 : i64} {
  func.func @_aggregate_mlp_kernel(%arg0: i32, %arg1: memref<1x128xi32, #tpu.memory_space<vmem>>, %arg2: memref<128x1xi32, #tpu.memory_space<vmem>>, %arg3: memref<128x128xf32, #tpu.memory_space<vmem>>, %arg4: memref<128x128xf32, #tpu.memory_space<vmem>>, %arg5: memref<1x128xf32, #tpu.memory_space<vmem>>, %arg6: memref<128x128xf32, #tpu.memory_space<vmem>>, %arg7: memref<1x128xf32, #tpu.memory_space<vmem>>, %arg8: memref<1x128xf32, #tpu.memory_space<vmem>>, %arg9: memref<8x128xf32, #tpu.memory_space<vmem>>, %arg10: memref<8x128xf32, #tpu.memory_space<vmem>>, %arg11: memref<8x1xf32, #tpu.memory_space<vmem>>) attributes {dimension_semantics = [#tpu.dimension_semantics<arbitrary>], iteration_bounds = array<i64: 1>, scalar_prefetch = 0 : i64, scratch_operands = 2 : i64, tpu.core_type = #tpu.core_type<tc>, window_params = [{transform_indices = @transform_0, window_bounds = array<i64: 1, 128>}, {transform_indices = @transform_1, window_bounds = array<i64: 128, 1>}, {transform_indices = @transform_2, window_bounds = array<i64: 128, 128>}, {pipeline_mode = #tpu.pipeline_mode<synchronous>, transform_indices = @transform_3, window_bounds = array<i64: 128, 128>}, {pipeline_mode = #tpu.pipeline_mode<synchronous>, transform_indices = @transform_4, window_bounds = array<i64: 1, 128>}, {pipeline_mode = #tpu.pipeline_mode<synchronous>, transform_indices = @transform_5, window_bounds = array<i64: 128, 128>}, {pipeline_mode = #tpu.pipeline_mode<synchronous>, transform_indices = @transform_6, window_bounds = array<i64: 1, 128>}, {pipeline_mode = #tpu.pipeline_mode<synchronous>, transform_indices = @transform_7, window_bounds = array<i64: 1, 128>}, {pipeline_mode = #tpu.pipeline_mode<synchronous>, transform_indices = @transform_8, window_bounds = array<i64: 8, 128>}]} {
    %c0_i32 = arith.constant 0 : i32
    %0 = arith.cmpi eq, %arg0, %c0_i32 : i32
    %1 = arith.extui %0 : i1 to i32
    %c0_i32_0 = arith.constant 0 : i32
    %2 = arith.cmpi ne, %1, %c0_i32_0 : i32
    scf.if %2 {
      %cst_15 = arith.constant 0.000000e+00 : f32
      %24 = vector.broadcast %cst_15 : f32 to vector<8x128xf32>
      %c0_16 = arith.constant 0 : index
      %c0_17 = arith.constant 0 : index
      %25 = vector.load %arg10[%c0_16, %c0_17] : memref<8x128xf32, #tpu.memory_space<vmem>>, vector<8x128xf32>
      tpu.vector_store %arg10[%c0_16, %c0_17], %24 {strides = array<i32>} : memref<8x128xf32, #tpu.memory_space<vmem>>, vector<8x128xf32>,
      %cst_18 = arith.constant 0.000000e+00 : f32
      %26 = vector.broadcast %cst_18 : f32 to vector<8x1xf32>
      %c0_19 = arith.constant 0 : index
      %c0_20 = arith.constant 0 : index
      %27 = vector.load %arg11[%c0_19, %c0_20] : memref<8x1xf32, #tpu.memory_space<vmem>>, vector<8x1xf32>
      tpu.vector_store %arg11[%c0_19, %c0_20], %26 {strides = array<i32>} : memref<8x1xf32, #tpu.memory_space<vmem>>, vector<8x1xf32>,
    } else {
    }
    %c0 = arith.constant 0 : index
    %c0_1 = arith.constant 0 : index
    %3 = vector.load %arg1[%c0, %c0_1] : memref<1x128xi32, #tpu.memory_space<vmem>>, vector<1x128xi32>
    %4 = tpu.iota {dimensions = array<i32: 0>} : vector<8x128xi32>
    %5 = vector.broadcast %3 : vector<1x128xi32> to vector<8x128xi32>
    %6 = arith.cmpi eq, %4, %5 : vector<8x128xi32>
    %c0_2 = arith.constant 0 : index
    %c0_3 = arith.constant 0 : index
    %7 = vector.load %arg11[%c0_2, %c0_3] : memref<8x1xf32, #tpu.memory_space<vmem>>, vector<8x1xf32>
    %8 = arith.extui %6 : vector<8x128xi1> to vector<8x128xi32>
    %9 = arith.sitofp %8 : vector<8x128xi32> to vector<8x128xf32>
    %cst = arith.constant dense<0.000000e+00> : vector<8xf32>
    %10 = vector.multi_reduction <add>, %9, %cst [1] : vector<8x128xf32> to vector<8xf32>
    %11 = vector.shape_cast %10 : vector<8xf32> to vector<8x1xf32>
    %12 = arith.addf %7, %11 : vector<8x1xf32>
    %c0_4 = arith.constant 0 : index
    %c0_5 = arith.constant 0 : index
    %13 = vector.load %arg11[%c0_4, %c0_5] : memref<8x1xf32, #tpu.memory_space<vmem>>, vector<8x1xf32>
    tpu.vector_store %arg11[%c0_4, %c0_5], %12 {strides = array<i32>} : memref<8x1xf32, #tpu.memory_space<vmem>>, vector<8x1xf32>,
    %c0_6 = arith.constant 0 : index
    %c0_7 = arith.constant 0 : index
    %14 = vector.load %arg10[%c0_6, %c0_7] : memref<8x128xf32, #tpu.memory_space<vmem>>, vector<8x128xf32>
    %15 = arith.extui %6 : vector<8x128xi1> to vector<8x128xi32>
    %16 = arith.sitofp %15 : vector<8x128xi32> to vector<8x128xf32>
    %c0_8 = arith.constant 0 : index
    %c0_9 = arith.constant 0 : index
    %17 = vector.load %arg3[%c0_8, %c0_9] : memref<128x128xf32, #tpu.memory_space<vmem>>, vector<128x128xf32>
    %cst_10 = arith.constant dense<0.000000e+00> : vector<8x128xf32>
    %18 = tpu.matmul %16, %17, %cst_10 {dimension_numbers = #tpu.dot_dimension_numbers<[1], [0], [0], [1], [0, 0, 1, 1], [], []>} : vector<8x128xf32>, vector<128x128xf32>, vector<8x128xf32> -> vector<8x128xf32>
    %19 = arith.addf %14, %18 : vector<8x128xf32>
    %c0_11 = arith.constant 0 : index
    %c0_12 = arith.constant 0 : index
    %20 = vector.load %arg10[%c0_11, %c0_12] : memref<8x128xf32, #tpu.memory_space<vmem>>, vector<8x128xf32>
    tpu.vector_store %arg10[%c0_11, %c0_12], %19 {strides = array<i32>} : memref<8x128xf32, #tpu.memory_space<vmem>>, vector<8x128xf32>,
    %c0_i32_13 = arith.constant 0 : i32
    %21 = arith.cmpi eq, %arg0, %c0_i32_13 : i32
    %22 = arith.extui %21 : i1 to i32
    %c0_i32_14 = arith.constant 0 : i32
    %23 = arith.cmpi ne, %22, %c0_i32_14 : i32
    scf.if %23 {
      %c0_15 = arith.constant 0 : index
      %c0_16 = arith.constant 0 : index
      %24 = vector.load %arg10[%c0_15, %c0_16] : memref<8x128xf32, #tpu.memory_space<vmem>>, vector<8x128xf32>
      %c0_17 = arith.constant 0 : index
      %c0_18 = arith.constant 0 : index
      %25 = vector.load %arg11[%c0_17, %c0_18] : memref<8x1xf32, #tpu.memory_space<vmem>>, vector<8x1xf32>
      %cst_19 = arith.constant 1.000000e+00 : f32
      %26 = vector.broadcast %cst_19 : f32 to vector<8x1xf32>
      %27 = arith.maximumf %25, %26 : vector<8x1xf32>
      %28 = vector.broadcast %27 : vector<8x1xf32> to vector<8x128xf32>
      %29 = arith.divf %24, %28 : vector<8x128xf32>
      %c0_20 = arith.constant 0 : index
      %c0_21 = arith.constant 0 : index
      %30 = vector.load %arg4[%c0_20, %c0_21] : memref<128x128xf32, #tpu.memory_space<vmem>>, vector<128x128xf32>
      %cst_22 = arith.constant dense<0.000000e+00> : vector<8x128xf32>
      %31 = tpu.matmul %29, %30, %cst_22 {dimension_numbers = #tpu.dot_dimension_numbers<[1], [0], [0], [1], [0, 0, 1, 1], [], []>} : vector<8x128xf32>, vector<128x128xf32>, vector<8x128xf32> -> vector<8x128xf32>
      %c0_23 = arith.constant 0 : index
      %c0_24 = arith.constant 0 : index
      %32 = vector.load %arg5[%c0_23, %c0_24] : memref<1x128xf32, #tpu.memory_space<vmem>>, vector<1x128xf32>
      %33 = vector.broadcast %32 : vector<1x128xf32> to vector<8x128xf32>
      %34 = arith.addf %31, %33 : vector<8x128xf32>
      %cst_25 = arith.constant 0.000000e+00 : f32
      %35 = vector.broadcast %cst_25 : f32 to vector<8x128xf32>
      %36 = arith.maximumf %34, %35 : vector<8x128xf32>
      %c0_26 = arith.constant 0 : index
      %c0_27 = arith.constant 0 : index
      %37 = vector.load %arg6[%c0_26, %c0_27] : memref<128x128xf32, #tpu.memory_space<vmem>>, vector<128x128xf32>
      %cst_28 = arith.constant dense<0.000000e+00> : vector<8x128xf32>
      %38 = tpu.matmul %36, %37, %cst_28 {dimension_numbers = #tpu.dot_dimension_numbers<[1], [0], [0], [1], [0, 0, 1, 1], [], []>} : vector<8x128xf32>, vector<128x128xf32>, vector<8x128xf32> -> vector<8x128xf32>
      %cst_29 = arith.constant dense<0.000000e+00> : vector<8xf32>
      %39 = vector.multi_reduction <add>, %38, %cst_29 [1] : vector<8x128xf32> to vector<8xf32>
      %40 = vector.shape_cast %39 : vector<8xf32> to vector<8x1xf32>
      %cst_30 = arith.constant 3.125000e-02 : f32
      %41 = vector.broadcast %cst_30 : f32 to vector<8x1xf32>
      %42 = arith.mulf %40, %41 : vector<8x1xf32>
      %43 = tpu.iota {dimensions = array<i32: 1>} : vector<8x128xi32>
      %c32_i32 = arith.constant 32 : i32
      %44 = vector.broadcast %c32_i32 : i32 to vector<8x128xi32>
      %45 = arith.cmpi slt, %43, %44 : vector<8x128xi32>
      %46 = vector.broadcast %42 : vector<8x1xf32> to vector<8x128xf32>
      %47 = arith.subf %38, %46 : vector<8x128xf32>
      %cst_31 = arith.constant 0.000000e+00 : f32
      %48 = vector.broadcast %cst_31 : f32 to vector<8x128xf32>
      %49 = arith.select %45, %47, %48 : vector<8x128xi1>, vector<8x128xf32>
      %50 = arith.mulf %49, %49 : vector<8x128xf32>
      %cst_32 = arith.constant dense<0.000000e+00> : vector<8xf32>
      %51 = vector.multi_reduction <add>, %50, %cst_32 [1] : vector<8x128xf32> to vector<8xf32>
      %52 = vector.shape_cast %51 : vector<8xf32> to vector<8x1xf32>
      %cst_33 = arith.constant 3.125000e-02 : f32
      %53 = vector.broadcast %cst_33 : f32 to vector<8x1xf32>
      %54 = arith.mulf %52, %53 : vector<8x1xf32>
      %cst_34 = arith.constant 9.99999974E-6 : f32
      %55 = vector.broadcast %cst_34 : f32 to vector<8x1xf32>
      %56 = arith.addf %54, %55 : vector<8x1xf32>
      %57 = math.rsqrt %56 : vector<8x1xf32>
      %58 = vector.broadcast %57 : vector<8x1xf32> to vector<8x128xf32>
      %59 = arith.mulf %49, %58 : vector<8x128xf32>
      %c0_35 = arith.constant 0 : index
      %c0_36 = arith.constant 0 : index
      %60 = vector.load %arg7[%c0_35, %c0_36] : memref<1x128xf32, #tpu.memory_space<vmem>>, vector<1x128xf32>
      %61 = vector.broadcast %60 : vector<1x128xf32> to vector<8x128xf32>
      %62 = arith.mulf %59, %61 : vector<8x128xf32>
      %c0_37 = arith.constant 0 : index
      %c0_38 = arith.constant 0 : index
      %63 = vector.load %arg8[%c0_37, %c0_38] : memref<1x128xf32, #tpu.memory_space<vmem>>, vector<1x128xf32>
      %64 = vector.broadcast %63 : vector<1x128xf32> to vector<8x128xf32>
      %65 = arith.addf %62, %64 : vector<8x128xf32>
      %c0_39 = arith.constant 0 : index
      %c0_40 = arith.constant 0 : index
      %66 = vector.load %arg9[%c0_39, %c0_40] : memref<8x128xf32, #tpu.memory_space<vmem>>, vector<8x128xf32>
      tpu.vector_store %arg9[%c0_39, %c0_40], %65 {strides = array<i32>} : memref<8x128xf32, #tpu.memory_space<vmem>>, vector<8x128xf32>,
    } else {
    }
    return
  }
  func.func @transform_0(%arg0: i32) -> (i32, i32) {
    %c0_i32 = arith.constant 0 : i32
    %c0_i32_0 = arith.constant 0 : i32
    return %c0_i32, %arg0 : i32, i32
  }
  func.func @transform_1(%arg0: i32) -> (i32, i32) {
    %c0_i32 = arith.constant 0 : i32
    %c0_i32_0 = arith.constant 0 : i32
    return %arg0, %c0_i32 : i32, i32
  }
  func.func @transform_2(%arg0: i32) -> (i32, i32) {
    %c0_i32 = arith.constant 0 : i32
    %c0_i32_0 = arith.constant 0 : i32
    return %arg0, %c0_i32 : i32, i32
  }
  func.func @transform_3(%arg0: i32) -> (i32, i32) {
    %c0_i32 = arith.constant 0 : i32
    %c0_i32_0 = arith.constant 0 : i32
    %c0_i32_1 = arith.constant 0 : i32
    return %c0_i32, %c0_i32_0 : i32, i32
  }
  func.func @transform_4(%arg0: i32) -> (i32, i32) {
    %c0_i32 = arith.constant 0 : i32
    %c0_i32_0 = arith.constant 0 : i32
    %c0_i32_1 = arith.constant 0 : i32
    return %c0_i32, %c0_i32_0 : i32, i32
  }
  func.func @transform_5(%arg0: i32) -> (i32, i32) {
    %c0_i32 = arith.constant 0 : i32
    %c0_i32_0 = arith.constant 0 : i32
    %c0_i32_1 = arith.constant 0 : i32
    return %c0_i32, %c0_i32_0 : i32, i32
  }
  func.func @transform_6(%arg0: i32) -> (i32, i32) {
    %c0_i32 = arith.constant 0 : i32
    %c0_i32_0 = arith.constant 0 : i32
    %c0_i32_1 = arith.constant 0 : i32
    return %c0_i32, %c0_i32_0 : i32, i32
  }
  func.func @transform_7(%arg0: i32) -> (i32, i32) {
    %c0_i32 = arith.constant 0 : i32
    %c0_i32_0 = arith.constant 0 : i32
    %c0_i32_1 = arith.constant 0 : i32
    return %c0_i32, %c0_i32_0 : i32, i32
  }
  func.func @transform_8(%arg0: i32) -> (i32, i32) {
    %c0_i32 = arith.constant 0 : i32
    %c0_i32_0 = arith.constant 0 : i32
    %c0_i32_1 = arith.constant 0 : i32
    return %c0_i32, %c0_i32_0 : i32, i32
  }
}

</mosaic_0001>

<bundles_post_ra>
// kernel: tpu_custom_call.1
= control target key start
LH: loop header
LB: loop body
LE: loop exit
PB: predicated region body
PF: predicated region fallthrough
CT: control target
= control target key end

     0   :  { %13 = vsyncpa [#allocation5], 0  ;;  %s921_s0 = inlined_call_operand.vmem [shape: s32[1,128], index: 0, kind: input, shape index: {}]   ;;  %s922_s1 = inlined_call_operand.vmem [shape: s32[128,1], index: 1, kind: input, shape index: {}]   ;;  %s923_s2 = inlined_call_operand.vmem [shape: f32[128,128], index: 2, kind: input, shape index: {}]   ;;  %s924_s3 = inlined_call_operand.hbm [shape: f32[128,128], index: 3, kind: input, shape index: {}]   ;;  %s925_s4 = inlined_call_operand.vmem [shape: f32[1,128], index: 4, kind: input, shape index: {}]   ;;  %s926_s5 = inlined_call_operand.hbm [shape: f32[128,128], index: 5, kind: input, shape index: {}]   ;;  %s927_s6 = inlined_call_operand.vmem [shape: f32[1,128], index: 6, kind: input, shape index: {}]   ;;  %s928_s7 = inlined_call_operand.vmem [shape: f32[1,128], index: 7, kind: input, shape index: {}]   ;;  %s929_s8 = inlined_call_operand.hbm [shape: f32[8,128], index: 8, kind: output, shape index: {}]  }
   0x1   :  { %14 = vsyncpa [#allocation8], 0 }
   0x2   :  { %15 = vsyncpa [#allocation6], 0  ;;  %s732_s26 = smov [#allocation4]   ;;  %s660_s30 = scalar_lea.hbm %s924_s3, 2048 }
   0x3   :  { %s27_s27 = sshll.u32 %s732_s26, 4  ;;  %p661_p0 = scmp.ne.s32.totalorder %s924_s3, %s660_s30  ;;  %s28_s27 = int_to_ptr.vmem [resolvable:$true] %s27_s27 }
   0x4   :  { %p664_p1 = scmp.lt.u32.totalorder %s660_s30, %s924_s3 }
   0x6   :  { %p666_p2 = pnand %p664_p1, %p661_p0 }
   0x8   :  { %669 = shalt.err (!%p666_p2)
}
   0x9   :  { %s670_s13 = scalar_lea.vmem %s28_s27, 2048  ;;  %p675_p4 = scmp.lt.s32.totalorder %s28_s27, %s28_s27 }
   0xa   :  { %p671_p3 = scmp.ne.s32.totalorder %s28_s27, %s670_s13  ;;  %p676_p5 = scmp.lt.s32.totalorder %s670_s13, %s670_s13 }
   0xc   :  { %p677_p6 = por %p676_p5, %p675_p4 }
   0xe   :  { %p678_p7 = pnand %p677_p6, %p671_p3 }
  0x10   :  { %681 = shalt.err (!%p678_p7)
}
  0x11   :  { %s733_s14 = smov 128   ;;  %s734_s15 = smov 8  }
  0x12   :  { %33 = dma.hbm_to_vmem [thread:$0]  %s924_s3, 2048, %s28_s27, [#allocation5], %s733_s14, %s733_s14, %s734_s15  }
  0x13   :  { %s735_s18 = smov [#allocation7]   ;;  %s682_s22 = scalar_lea.hbm %s926_s5, 2048 }
  0x14   :  { %s41_s19 = sshll.u32 %s735_s18, 4  ;;  %p683_p8 = scmp.ne.s32.totalorder %s926_s5, %s682_s22  ;;  %s42_s19 = int_to_ptr.vmem [resolvable:$true] %s41_s19 }
  0x15   :  { %p686_p9 = scmp.lt.u32.totalorder %s682_s22, %s926_s5 }
  0x17   :  { %p688_p10 = pnand %p686_p9, %p683_p8 }
  0x19   :  { %691 = shalt.err (!%p688_p10)
}
  0x1a   :  { %s692_s26 = scalar_lea.vmem %s42_s19, 2048  ;;  %p697_p12 = scmp.lt.s32.totalorder %s42_s19, %s42_s19 }
  0x1b   :  { %p693_p11 = scmp.ne.s32.totalorder %s42_s19, %s692_s26  ;;  %p698_p13 = scmp.lt.s32.totalorder %s692_s26, %s692_s26 }
  0x1d   :  { %p699_p0 = por %p698_p13, %p697_p12 }
  0x1f   :  { %p700_p1 = pnand %p699_p0, %p693_p11 }
  0x21   :  { %703 = shalt.err (!%p700_p1)
}
  0x22   :  { %47 = dma.hbm_to_vmem [thread:$0]  %s926_s5, 2048, %s42_s19, [#allocation8], %s733_s14, %s733_s14, %s734_s15  }
  0x23   :  { %726 = dma.done.wait [#allocation5], 2048  }
  0x24   :  { %727 = vsyncadd [#allocation5], 4294965248 }
  0x25   :  { %728 = dma.done.wait [#allocation8], 2048  }
  0x26   :  { %729 = vsyncadd [#allocation8], 4294965248  ;;  %vm63_vm0 = vcmask 7168   ;;  %v66_v0 = vlaneseq  ;;  %v736_v1 = vmov 0.0   ;;  %v737_v2 = vmov 0.0|0.0   ;;  %v82_v5 = vld [vmem:[%s923_s2] sm:$0xff] }
  0x27   :  { %64 = vst.msk [vmem:[#allocation3] sm:$0xff] %vm63_vm0, %v736_v1  ;;  %573 = vmatprep.subr.bf16.mxu0 %v737_v2  ;;  %597 = vmatprep.subr.bf16.mxu1 %v737_v2  ;;  %vm738_vm1 = vmmov 0   ;;  %v411_v4 = vld [vmem:[%s921_s0] ss:$0 sm:$0xff]  ;;  %v83_v6 = vld [vmem:[%s923_s2 + $0x8] sm:$0xff]  ;;  %v84_v8 = vld [vmem:[%s923_s2 + $0x10] sm:$0xff] }
  0x28   :  { %500 = vmatprep.mubr.msk.f32.mxu0 %vm738_vm1, %v736_v1  ;;  %535 = vmatprep.mubr.msk.f32.mxu1 %vm738_vm1, %v736_v1  ;;  %v67_v3 = vshrl.u32 %v66_v0, 7  ;;  %v574_v7 = vpack.c.bf16 %v83_v6, %v82_v5  ;;  %v85_v9 = vld [vmem:[%s923_s2 + $0x18] sm:$0xff]  ;;  %v86_v12 = vld [vmem:[%s923_s2 + $0x20] sm:$0xff]  ;;  %v87_v13 = vld [vmem:[%s923_s2 + $0x28] sm:$0xff]  ;;  %v739_v26 = vmov 0   ;;  %v740_v39 = vmov 1.0  }
  0x29   :  { %v577_v11 = vpack.c.bf16 %v85_v9, %v84_v8  ;;  %v580_v14 = vpack.c.bf16 %v87_v13, %v86_v12  ;;  %v88_v15 = vld [vmem:[%s923_s2 + $0x30] sm:$0xff]  ;;  %v89_v16 = vld [vmem:[%s923_s2 + $0x38] sm:$0xff]  ;;  %v90_v18 = vld [vmem:[%s923_s2 + $0x40] sm:$0xff]  ;;  %655 = vset.pattern.permute.xlu0 %v739_v26  ;;  %s741_s16 = smov [#allocation9]  }
  0x2a   :  { %vm72_vm2 = vcmp.eq.s32.totalorder %v67_v3, %v411_v4  ;;  %575 = vmatpush3.bf16.msra.mxu0 %v574_v7  ;;  %v583_v17 = vpack.c.bf16 %v89_v16, %v88_v15  ;;  %v91_v19 = vld [vmem:[%s923_s2 + $0x48] sm:$0xff]  ;;  %v92_v21 = vld [vmem:[%s923_s2 + $0x50] sm:$0xff]  ;;  %v93_v22 = vld [vmem:[%s923_s2 + $0x58] sm:$0xff]  ;;  %s401_s17 = sshll.u32 %s741_s16, 4  ;;  %s402_s17 = int_to_ptr.vmem [resolvable:$true] %s401_s17 }
  0x2b   :  { %v412_v10 = vsel %vm72_vm2, 1.0, %v736_v1  ;;  %576 = vmatprep.subr.bf16.mxu0 %v737_v2  ;;  %v586_v20 = vpack.c.bf16 %v91_v19, %v90_v18  ;;  %v589_v23 = vpack.c.bf16 %v93_v22, %v92_v21  ;;  %v94_v24 = vld [vmem:[%s923_s2 + $0x60] sm:$0xff]  ;;  %v95_v25 = vld [vmem:[%s923_s2 + $0x68] sm:$0xff]  ;;  %v96_v28 = vld [vmem:[%s923_s2 + $0x70] sm:$0xff]  ;;  %s704_s18 = scalar_lea.vmem %s402_s17, 128  ;;  %p709_p3 = scmp.lt.s32.totalorder %s402_s17, %s402_s17 }
  0x2c   :  { %76 = vadd.xlane.f32.xlu0 %v412_v10  ;;  %v592_v27 = vpack.c.bf16 %v95_v25, %v94_v24  ;;  %v97_v29 = vld [vmem:[%s923_s2 + $0x78] sm:$0xff]  ;;  %v183_v31 = vld [vmem:[#allocation4] sm:$0xff]  ;;  %v184_v32 = vld [vmem:[#allocation4 + $0x8] sm:$0xff]  ;;  %p705_p2 = scmp.ne.s32.totalorder %s402_s17, %s704_s18  ;;  %p710_p4 = scmp.lt.s32.totalorder %s704_s18, %s704_s18 }
  0x2d   :  { %v595_v30 = vpack.c.bf16 %v97_v29, %v96_v28  ;;  %v185_v33 = vld [vmem:[#allocation4 + $0x10] sm:$0xff]  ;;  %v598_v34 = vpack.c.bf16 %v184_v32, %v183_v31  ;;  %v186_v35 = vld [vmem:[#allocation4 + $0x18] sm:$0xff]  ;;  %v187_v37 = vld [vmem:[#allocation4 + $0x20] sm:$0xff] }
  0x2e   :  { %578 = vmatpush3.bf16.msra.mxu0 %v577_v11  ;;  %v601_v36 = vpack.c.bf16 %v186_v35, %v185_v33  ;;  %v188_v38 = vld [vmem:[#allocation4 + $0x28] sm:$0xff]  ;;  %v189_v41 = vld [vmem:[#allocation4 + $0x30] sm:$0xff]  ;;  %v190_v42 = vld [vmem:[#allocation4 + $0x38] sm:$0xff]  ;;  %p711_p5 = por %p710_p4, %p709_p3 }
  0x2f   :  { %579 = vmatprep.subr.bf16.mxu0 %v737_v2  ;;  %599 = vmatpush3.bf16.msra.mxu1 %v598_v34  ;;  %v604_v40 = vpack.c.bf16 %v188_v38, %v187_v37  ;;  %v607_v43 = vpack.c.bf16 %v190_v42, %v189_v41  ;;  %v191_v44 = vld [vmem:[#allocation4 + $0x40] sm:$0xff]  ;;  %v192_v45 = vld [vmem:[#allocation4 + $0x48] sm:$0xff]  ;;  %v73_v47 = vld [vmem:[#allocation3] sm:$0xff]  ;;  %v367_v34 = vand.u32 127, %v66_v0 }
  0x30   :  { %600 = vmatprep.subr.bf16.mxu1 %v737_v2  ;;  %v610_v46 = vpack.c.bf16 %v192_v45, %v191_v44  ;;  %v193_v52 = vld [vmem:[#allocation4 + $0x50] sm:$0xff]  ;;  %v194_v53 = vld [vmem:[#allocation4 + $0x58] sm:$0xff]  ;;  %v195_v55 = vld [vmem:[#allocation4 + $0x60] sm:$0xff]  ;;  %p712_p6 = pnand %p711_p5, %p705_p2 }
  0x31   :  { %v613_v54 = vpack.c.bf16 %v194_v53, %v193_v52  ;;  %v196_v56 = vld [vmem:[#allocation4 + $0x68] sm:$0xff]  ;;  %v197_v58 = vld [vmem:[#allocation4 + $0x70] sm:$0xff]  ;;  %v198_v59 = vld [vmem:[#allocation4 + $0x78] sm:$0xff]  ;;  %vm368_vm3 = vcmp.lt.s32.totalorder %v367_v34, 32 }
  0x32   :  { %581 = vmatpush3.bf16.msra.mxu0 %v580_v14  ;;  %v616_v57 = vpack.c.bf16 %v196_v56, %v195_v55  ;;  %v619_v60 = vpack.c.bf16 %v198_v59, %v197_v58  ;;  %v277_v61 = vld [vmem:[#allocation7] sm:$0xff]  ;;  %v278_v62 = vld [vmem:[#allocation7 + $0x8] sm:$0xff]  ;;  %v279_v63 = vld [vmem:[#allocation7 + $0x10] sm:$0xff] }
  0x33   :  { %582 = vmatprep.subr.bf16.mxu0 %v737_v2  ;;  %602 = vmatpush3.bf16.msra.mxu1 %v601_v36  ;;  %v280_v3 = vld [vmem:[#allocation7 + $0x18] sm:$0xff]  ;;  %v281_v5 = vld [vmem:[#allocation7 + $0x20] sm:$0xff]  ;;  %v282_v6 = vld [vmem:[#allocation7 + $0x28] sm:$0xff] }
  0x34   :  { %603 = vmatprep.subr.bf16.mxu1 %v737_v2  ;;  %v625_v4 = vpack.c.bf16 %v280_v3, %v279_v63  ;;  %v628_v7 = vpack.c.bf16 %v282_v6, %v281_v5  ;;  %v283_v8 = vld [vmem:[#allocation7 + $0x30] sm:$0xff]  ;;  %v284_v9 = vld [vmem:[#allocation7 + $0x38] sm:$0xff]  ;;  %v285_v11 = vld [vmem:[#allocation7 + $0x40] sm:$0xff] }
  0x35   :  { %v631_v10 = vpack.c.bf16 %v284_v9, %v283_v8  ;;  %v286_v12 = vld [vmem:[#allocation7 + $0x48] sm:$0xff]  ;;  %v287_v14 = vld [vmem:[#allocation7 + $0x50] sm:$0xff]  ;;  %v288_v15 = vld [vmem:[#allocation7 + $0x58] sm:$0xff] }
  0x36   :  { %584 = vmatpush3.bf16.msra.mxu0 %v583_v17  ;;  %v634_v13 = vpack.c.bf16 %v286_v12, %v285_v11  ;;  %v637_v16 = vpack.c.bf16 %v288_v15, %v287_v14  ;;  %v289_v17 = vld [vmem:[#allocation7 + $0x60] sm:$0xff]  ;;  %v290_v18 = vld [vmem:[#allocation7 + $0x68] sm:$0xff]  ;;  %v291_v25 = vld [vmem:[#allocation7 + $0x70] sm:$0xff] }
  0x37   :  { %585 = vmatprep.subr.bf16.mxu0 %v737_v2  ;;  %605 = vmatpush3.bf16.msra.mxu1 %v604_v40  ;;  %v640_v19 = vpack.c.bf16 %v290_v18, %v289_v17  ;;  %v292_v26 = vld [vmem:[#allocation7 + $0x78] sm:$0xff] }
  0x38   :  { %606 = vmatprep.subr.bf16.mxu1 %v737_v2  ;;  %v414_v28 = vld [vmem:[%s925_s4] ss:$0 sm:$0xff] }
  0x39   :  { %v415_v44 = vld [vmem:[%s927_s6] ss:$0 sm:$0xff] }
  0x3a   :  { %587 = vmatpush3.bf16.msra.mxu0 %v586_v20  ;;  %v416_v0 = vld [vmem:[%s928_s7] ss:$0 sm:$0xff] }
  0x3b   :  { %588 = vmatprep.subr.bf16.mxu0 %v737_v2  ;;  %608 = vmatpush3.bf16.msra.mxu1 %v607_v43 }
  0x3c   :  { %609 = vmatprep.subr.bf16.mxu1 %v737_v2 }
  0x3e   :  { %590 = vmatpush3.bf16.msra.mxu0 %v589_v23 }
  0x3f   :  { %591 = vmatprep.subr.bf16.mxu0 %v737_v2  ;;  %611 = vmatpush3.bf16.msra.mxu1 %v610_v46 }
  0x40   :  { %612 = vmatprep.subr.bf16.mxu1 %v737_v2 }
  0x42   :  { %593 = vmatpush3.bf16.msra.mxu0 %v592_v27  ;;  %v643_v27 = vpack.c.bf16 %v292_v26, %v291_v25 }
  0x43   :  { %594 = vmatprep.subr.bf16.mxu0 %v737_v2  ;;  %614 = vmatpush3.bf16.msra.mxu1 %v613_v54 }
  0x44   :  { %615 = vmatprep.subr.bf16.mxu1 %v737_v2 }
  0x46   :  { %596 = vmatpush3.bf16.msra.mxu0 %v595_v30 }
  0x47   :  { %621 = vmatprep.subr.bf16.mxu0 %v737_v2  ;;  %617 = vmatpush3.bf16.msra.mxu1 %v616_v57 }
  0x48   :  { %618 = vmatprep.subr.bf16.mxu1 %v737_v2 }
  0x49   :  { %501 = vmatmul.mubr.msk.f32.vlgmr.msra.gmra.mrb[0].mxu0 %vm72_vm2, %v740_v39 }
  0x4a   :  { %570 = vmatprep.mubr.msk.f32.mxu0 %vm738_vm1, %v736_v1  ;;  %v622_v1 = vpack.c.bf16 %v278_v62, %v277_v61 }
  0x4b   :  { %620 = vmatpush3.bf16.msra.mxu1 %v619_v60 }
  0x4c   :  { %623 = vmatpush3.bf16.msra.mxu0 %v622_v1 }
  0x4d   :  { %624 = vmatprep.subr.bf16.mxu0 %v737_v2 }
  0x50   :  { %626 = vmatpush3.bf16.msra.mxu0 %v625_v4 }
  0x51   :  { %627 = vmatprep.subr.bf16.mxu0 %v737_v2 }
  0x54   :  { %629 = vmatpush3.bf16.msra.mxu0 %v628_v7 }
  0x55   :  { %630 = vmatprep.subr.bf16.mxu0 %v737_v2 }
  0x58   :  { %632 = vmatpush3.bf16.msra.mxu0 %v631_v10 }
  0x59   :  { %633 = vmatprep.subr.bf16.mxu0 %v737_v2 }
  0x5c   :  { %635 = vmatpush3.bf16.msra.mxu0 %v634_v13 }
  0x5d   :  { %636 = vmatprep.subr.bf16.mxu0 %v737_v2 }
  0x60   :  { %638 = vmatpush3.bf16.msra.mxu0 %v637_v16 }
  0x61   :  { %639 = vmatprep.subr.bf16.mxu0 %v737_v2 }
  0x64   :  { %641 = vmatpush3.bf16.msra.mxu0 %v640_v19 }
  0x65   :  { %642 = vmatprep.subr.bf16.mxu0 %v737_v2 }
  0x68   :  { %644 = vmatpush3.bf16.msra.mxu0 %v643_v27 }
  0xb9   :  { %v77_v48 = vpop.xlane.xlu0 %76 }
  0xba   :  { %v78_v49 = vadd.f32 %v77_v48, %v73_v47 }
  0xbc   :  { %80 = vst.msk [vmem:[#allocation3] sm:$0xff] %vm63_vm0, %v78_v49 }
  0xc3   :  { %v174_v50 = vld [vmem:[#allocation3] sm:$0xff] }
  0xc4   :  { %v175_v51 = vmax.f32 %v174_v50, 1.0 }
  0xc6   :  { %178 = vperm.xlu0 %655, %v175_v51  }
 0x11c   :  { %v164_v20 = vpop.f32.mrb[0].mxu0 }
 0x11d   :  { %v502_v21 = vpop.f32.mrb[1].mxu0 }
 0x145   :  { %v179_v22 = vpop.permute.xlu0 %178 }
 0x146   :  { %656 = vrcp.f32 %v179_v22 }
 0x150   :  { %v657_v23 = vpop.eup %656 }
 0x151   :  { %v182_v24 = vmul.f32 %v657_v23, %v164_v20 }
 0x153   :  { %536 = vmatmul.mubr.f32.vlgmr.msra.gmra.mrb[0].mxu1 %v182_v24 }
 0x226   :  { %v272_v29 = vpop.f32.mrb[0].mxu1 }
 0x227   :  { %v273_v30 = vadd.f32 %v414_v28, %v272_v29  ;;  %v537_v31 = vpop.f32.mrb[1].mxu1 }
 0x229   :  { %v276_v32 = vmax.f32 %v273_v30, 0.0 }
 0x22b   :  { %571 = vmatmul.mubr.f32.vlgmr.msra.gmra.mrb[2].mxu0 %v276_v32 }
 0x2fe   :  { %v359_v2 = vpop.f32.mrb[2].mxu0 }
 0x2ff   :  { %363 = vadd.xlane.f32.xlu1 %v359_v2  ;;  %v572_v33 = vpop.f32.mrb[3].mxu0 }
 0x38c   :  { %v364_v35 = vpop.xlane.xlu1 %363 }
 0x38d   :  { %v365_v36 = vmul.f32 0.03125, %v364_v35 }
 0x38f   :  { %v369_v37 = vsub.f32 %v359_v2, %v365_v36 }
 0x391   :  { %v370_v38 = vsel %vm368_vm3, %v369_v37, 0.0 }
 0x392   :  { %v371_v39 = vmul.f32 %v370_v38, %v370_v38 }
 0x394   :  { %372 = vadd.xlane.f32.xlu1 %v371_v39 }
 0x421   :  { %v373_v40 = vpop.xlane.xlu1 %372 }
 0x422   :  { %v374_v41 = vmul.f32 0.03125, %v373_v40 }
 0x424   :  { %v375_v42 = vadd.f32 1e-05, %v374_v41 }
 0x426   :  { %658 = vrsqrt.f32 %v375_v42 }
 0x430   :  { %v659_v43 = vpop.eup %658 }
 0x431   :  { %v377_v45 = vmul.f32 %v659_v43, %v370_v38 }
 0x433   :  { %v385_v46 = vmul.f32 %v415_v44, %v377_v45 }
 0x435   :  { %v393_v47 = vadd.f32 %v416_v0, %v385_v46 }
 0x437   :  { %394 = vst [vmem:[#allocation9] sm:$0xff] %v393_v47 }
 0x438   :  { %715 = shalt.err (!%p712_p6)
}
 0x439   :  { %s716_s20 = scalar_lea.hbm %s929_s8, 128 }
 0x43a   :  { %p717_p7 = scmp.ne.s32.totalorder %s929_s8, %s716_s20  ;;  %p720_p8 = scmp.lt.u32.totalorder %s716_s20, %s929_s8 }
 0x43c   :  { %p722_p9 = pnand %p720_p8, %p717_p7 }
 0x43e   :  { %725 = shalt.err (!%p722_p9)
}
 0x43f   :  { %404 = dma.vmem_to_hbm [thread:$0]  %s402_s17, 128, %s929_s8, [#allocation6]  }
 0x440   :  { %730 = dma.done.wait [#allocation6], 128  }
 0x441   :  { %731 = vsyncadd [#allocation6], 4294967168 }
 0x442   :  { %408 = vsyncpa [#allocation5], 1 }
 0x443   :  { %409 = vsyncpa [#allocation8], 1 }
 0x444   :  { %410 = vsyncpa [#allocation6], 1 }

</bundles_post_ra>
